<compile_context>
chip_gen: v5e
topology: v5e:2x2
jax: 0.10.0
libtpu: 0.0.40
codegen_flags: <defaults>
</compile_context>

<pallas_src>
import functools

import jax
import jax.numpy as jnp
from jax import lax
from jax.experimental import pallas as pl
from jax.experimental.pallas import tpu as pltpu


LANE_W = 128  # lane width of the packed parameter slab / output tile


def _ru8(x):
  return ((x + 7) // 8) * 8


def _slab_layout(L, d, H, h_dim):
  """Static row offsets of each parameter section inside the packed slab."""
  assert d <= LANE_W and 3 * H <= LANE_W and h_dim <= LANE_W
  off_emb = 0                       # (L, d)
  off_wih = _ru8(L)                 # (d, 3H)   W_ih^T, gates r|z|n along lanes
  off_whh = off_wih + _ru8(d)       # (H, 3H)   W_hh^T
  off_w1 = off_whh + _ru8(H)        # (H, h_dim) mlp[0].weight^T
  off_bias = off_w1 + _ru8(H)       # 7 bias rows (see kernel)
  rows = _ru8(off_bias + 7)
  return dict(emb=off_emb, wih=off_wih, whh=off_whh, w1=off_w1,
              bias=off_bias, rows=rows)


# ----------------------------------------------------------------------------
# Pallas kernel (gridless; everything fits in a few KiB of VMEM)
# ----------------------------------------------------------------------------
def _hyper_kernel(slab_ref, out_ref, *, L, d, H, h_dim, p, lay):
  o_emb, o_wih, o_whh = lay["emb"], lay["wih"], lay["whh"]
  o_w1, o_b = lay["w1"], lay["bias"]

  # ---- static views into the packed parameter slab (one-time loads) ----
  emb = slab_ref[o_emb:o_emb + L, 0:d]                      # (L, d)
  wih = slab_ref[o_wih:o_wih + d, 0:3 * H]                  # (d, 3H)
  whh = slab_ref[o_whh:o_whh + H, 0:3 * H]                  # (H, 3H)
  w1 = slab_ref[o_w1:o_w1 + H, 0:h_dim]                     # (H, h_dim)
  b_cat = slab_ref[o_b + 0:o_b + 1, 0:3 * H]                # b_ih(+b_hh r/z)
  bhh_n = slab_ref[o_b + 1:o_b + 2, 0:H]                    # b_hh_n
  b1 = slab_ref[o_b + 2:o_b + 3, 0:h_dim]
  gamma = slab_ref[o_b + 3:o_b + 4, 0:h_dim]
  beta = slab_ref[o_b + 4:o_b + 5, 0:h_dim]
  w2 = slab_ref[o_b + 5:o_b + 6, 0:h_dim]
  b2 = slab_ref[o_b + 6:o_b + 7, 0:1]

  # ---- fused input projection for all timesteps (off the serial chain) ----
  gx = jnp.dot(emb, wih, preferred_element_type=jnp.float32) + b_cat  # (L,3H)
  gx_r = gx[:, 0:H]
  gx_z = gx[:, H:2 * H]
  gx_n = gx[:, 2 * H:3 * H]

  # ---- GRU recurrence (L static -> fully unrolled; h lives in vregs) ----
  # t = 0 with h_0 = 0: skip the hidden matmul entirely.
  r = jax.nn.sigmoid(gx_r[0:1, :])
  z = jax.nn.sigmoid(gx_z[0:1, :])
  n = jnp.tanh(gx_n[0:1, :] + r * bhh_n)
  h = (1.0 - z) * n
  hs = [h]
  for t in range(1, L):
    gh = jnp.dot(h, whh, preferred_element_type=jnp.float32)          # (1,3H)
    r = jax.nn.sigmoid(gx_r[t:t + 1, :] + gh[:, 0:H])
    z = jax.nn.sigmoid(gx_z[t:t + 1, :] + gh[:, H:2 * H])
    n = jnp.tanh(gx_n[t:t + 1, :] + r * (gh[:, 2 * H:3 * H] + bhh_n))
    h = (1.0 - z) * n + z * h
    hs.append(h)
  gru_out = jnp.concatenate(hs, axis=0)                                # (L,H)

  # ---- MLP: Linear -> BatchNorm1d (training-mode batch stats) -> ReLU ----
  x1 = jnp.dot(gru_out, w1, preferred_element_type=jnp.float32) + b1   # (L,h)
  mean = jnp.mean(x1, axis=0, keepdims=True)
  var = jnp.mean((x1 - mean) ** 2, axis=0, keepdims=True)   # biased (PyTorch)
  xhat = (x1 - mean) * lax.rsqrt(var + 1e-5)
  x1 = jnp.maximum(gamma * xhat + beta, 0.0)

  # Final Linear(h_dim -> 1) on the VPU (broadcast multiply + lane reduce).
  logits = jnp.sum(x1 * w2, axis=1, keepdims=True) + b2                # (L,1)
  v = jax.nn.sigmoid(logits)
  loss = jnp.mean((v - p) ** 2).reshape(1, 1)

  # ---- single lane-dense output tile: col 0 = v, col 1 = loss ----
  lane = lax.broadcasted_iota(jnp.int32, (L, LANE_W), 1)
  packed = jnp.where(lane == 0, v, jnp.where(lane == 1, loss, 0.0))
  out_ref[...] = packed


# ----------------------------------------------------------------------------
# One-time parameter packing (hoisted out of the per-call path)
# ----------------------------------------------------------------------------
def prepare_params(params):
  """Transpose / split / fold / pack everything into one (rows, 128) slab."""
  f32 = jnp.float32
  L, d = params["emb"].shape
  H = params["w_hh"].shape[1]
  h_dim = params["w1"].shape[0]
  lay = _slab_layout(L, d, H, h_dim)

  w_ih = params["w_ih"].astype(f32)            # (3H, d)  rows: r|z|n
  w_hh = params["w_hh"].astype(f32)            # (3H, H)
  b_ih = params["b_ih"].astype(f32)            # (3H,)
  b_hh = params["b_hh"].astype(f32)            # (3H,)

  wih_cat = w_ih.T                             # (d, 3H)  cols: r|z|n
  whh_cat = w_hh.T                             # (H, 3H)
  b_cat = jnp.concatenate([b_ih[0:H] + b_hh[0:H],          # fold b_hh_r
                           b_ih[H:2 * H] + b_hh[H:2 * H],  # fold b_hh_z
                           b_ih[2 * H:]])                   # b_ih_n only
  bhh_n = b_hh[2 * H:]                          # stays inside r*(...)

  slab = jnp.zeros((lay["rows"], LANE_W), f32)
  slab = slab.at[lay["emb"]:lay["emb"] + L, 0:d].set(params["emb"].astype(f32))
  slab = slab.at[lay["wih"]:lay["wih"] + d, 0:3 * H].set(wih_cat)
  slab = slab.at[lay["whh"]:lay["whh"] + H, 0:3 * H].set(whh_cat)
  slab = slab.at[lay["w1"]:lay["w1"] + H, 0:h_dim].set(
      params["w1"].astype(f32).T)
  b = lay["bias"]
  slab = slab.at[b + 0, 0:3 * H].set(b_cat)
  slab = slab.at[b + 1, 0:H].set(bhh_n)
  slab = slab.at[b + 2, 0:h_dim].set(params["b1"].astype(f32))
  slab = slab.at[b + 3, 0:h_dim].set(params["gamma"].astype(f32))
  slab = slab.at[b + 4, 0:h_dim].set(params["beta"].astype(f32))
  slab = slab.at[b + 5, 0:h_dim].set(params["w2"].astype(f32).reshape(h_dim))
  slab = slab.at[b + 6, 0:1].set(params["b2"].astype(f32))
  return slab


# ----------------------------------------------------------------------------
# Forward builder
# ----------------------------------------------------------------------------
def make_forward(num_layers, d, gru_hidden_dim, h_dim, *, p=0.5):
  f32 = jnp.float32
  L, H = num_layers, gru_hidden_dim
  lay = _slab_layout(L, d, H, h_dim)
  kernel = functools.partial(_hyper_kernel, L=L, d=d, H=H, h_dim=h_dim,
                             p=float(p), lay=lay)

  vmem_spec = pl.BlockSpec(memory_space=pltpu.MemorySpace.VMEM)
  call = pl.pallas_call(
      kernel,
      out_shape=jax.ShapeDtypeStruct((L, LANE_W), f32),
      in_specs=[vmem_spec],
      out_specs=vmem_spec,
  )

  @jax.jit
  def forward(slab):
    out = call(slab)
    return out[:, 0:1], out[0, 1]          # v (L,1), scalar reg_loss

  # NOTE: a single network instance is purely latency-bound; for throughput
  # (and to use v7x's 2nd TensorCore) one would batch many instances along a
  # leading "parallel" grid axis — out of scope for this single-module port.
  return forward


# ----------------------------------------------------------------------------
# Pure-JAX reference (for correctness check)
# ----------------------------------------------------------------------------
def reference_forward(params, *, p=0.5):
  emb = params["emb"]
  w_ih, b_ih = params["w_ih"], params["b_ih"]
  w_hh, b_hh = params["w_hh"], params["b_hh"]
  H = w_hh.shape[1]

  def step(h, x):
    gx = w_ih @ x + b_ih
    gh = w_hh @ h + b_hh
    r = jax.nn.sigmoid(gx[:H] + gh[:H])
    z = jax.nn.sigmoid(gx[H:2 * H] + gh[H:2 * H])
    n = jnp.tanh(gx[2 * H:] + r * gh[2 * H:])
    h_new = (1.0 - z) * n + z * h
    return h_new, h_new

  h0 = jnp.zeros((H,), jnp.float32)
  _, outs = lax.scan(step, h0, emb)                 # (L, H)

  x1 = outs @ params["w1"].T + params["b1"]
  mean = jnp.mean(x1, axis=0, keepdims=True)
  var = jnp.mean((x1 - mean) ** 2, axis=0, keepdims=True)
  x1 = params["gamma"] * (x1 - mean) / jnp.sqrt(var + 1e-5) + params["beta"]
  x1 = jnp.maximum(x1, 0.0)
  logits = x1 @ params["w2"].T + params["b2"]
  v = jax.nn.sigmoid(logits)
  reg = jnp.mean((v - p) ** 2)
  return v, reg


# ----------------------------------------------------------------------------
# Deterministic parameter init + run
# ----------------------------------------------------------------------------
def init_params(key, num_layers, d, gru_hidden_dim, h_dim):
  ks = jax.random.split(key, 10)
  H = gru_hidden_dim
  scale_gru = 1.0 / jnp.sqrt(H)
  scale_l1 = 1.0 / jnp.sqrt(H)
  scale_l2 = 1.0 / jnp.sqrt(h_dim)
  f32 = jnp.float32
  return {
      "emb": 0.1 * jax.random.normal(ks[0], (num_layers, d), f32),
      "w_ih": scale_gru * jax.random.normal(ks[1], (3 * H, d), f32),
      "w_hh": scale_gru * jax.random.normal(ks[2], (3 * H, H), f32),
      "b_ih": scale_gru * jax.random.normal(ks[3], (3 * H,), f32),
      "b_hh": scale_gru * jax.random.normal(ks[4], (3 * H,), f32),
      "w1": scale_l1 * jax.random.normal(ks[5], (h_dim, H), f32),
      "b1": scale_l1 * jax.random.normal(ks[6], (h_dim,), f32),
      "gamma": jnp.ones((h_dim,), f32),   # BatchNorm1d default weight
      "beta": jnp.zeros((h_dim,), f32),   # BatchNorm1d default bias
      "w2": scale_l2 * jax.random.normal(ks[7], (1, h_dim), f32),
      "b2": scale_l2 * jax.random.normal(ks[8], (1,), f32),
  }


if __name__ == "__main__":
  num_layers, d, gru_hidden_dim, h_dim, p = 8, 16, 32, 32, 0.5
  params = init_params(jax.random.PRNGKey(0), num_layers, d, gru_hidden_dim,
                       h_dim)

  slab = prepare_params(params)                              # one-time prep
  forward = make_forward(num_layers, d, gru_hidden_dim, h_dim, p=p)

  v, reg_loss = forward(slab)
  jax.block_until_ready((v, reg_loss))

  v_ref, reg_ref = reference_forward(params, p=p)

  assert v.shape == (num_layers, 1)
  assert reg_loss.shape == ()
  assert jnp.allclose(v, v_ref, rtol=1e-4, atol=1e-4), (v, v_ref)
  assert jnp.allclose(reg_loss, reg_ref, rtol=1e-4, atol=1e-4), (reg_loss,
                                                                 reg_ref)

  # Module-API parity (PyTorch returns a list of per-layer control values);
  # callers index the (L,1) result lazily outside the hot path.
  v_list = [v[i] for i in range(num_layers)]
  assert all(vi.shape == (1,) for vi in v_list)

  print("KERNEL_OK")
</pallas_src>

<mosaic_0001>
module attributes {stable_mosaic.version = 11 : i64} {
  func.func @_hyper_kernel(%arg0: memref<96x128xf32, #tpu.memory_space<vmem>>, %arg1: memref<8x128xf32, #tpu.memory_space<vmem>>) attributes {dimension_semantics = [], scalar_prefetch = 0 : i64, scratch_operands = 0 : i64, tpu.core_type = #tpu.core_type<tc>} {
    %c0 = arith.constant 0 : index
    %c0_0 = arith.constant 0 : index
    %0 = vector.load %arg0[%c0, %c0_0] : memref<96x128xf32, #tpu.memory_space<vmem>>, vector<8x16xf32>
    %c8 = arith.constant 8 : index
    %c0_1 = arith.constant 0 : index
    %1 = vector.load %arg0[%c8, %c0_1] : memref<96x128xf32, #tpu.memory_space<vmem>>, vector<16x96xf32>
    %c24 = arith.constant 24 : index
    %c0_2 = arith.constant 0 : index
    %2 = vector.load %arg0[%c24, %c0_2] : memref<96x128xf32, #tpu.memory_space<vmem>>, vector<32x96xf32>
    %c56 = arith.constant 56 : index
    %c0_3 = arith.constant 0 : index
    %3 = vector.load %arg0[%c56, %c0_3] : memref<96x128xf32, #tpu.memory_space<vmem>>, vector<32x32xf32>
    %c88 = arith.constant 88 : index
    %c0_4 = arith.constant 0 : index
    %4 = vector.load %arg0[%c88, %c0_4] : memref<96x128xf32, #tpu.memory_space<vmem>>, vector<1x96xf32>
    %c89 = arith.constant 89 : index
    %c0_5 = arith.constant 0 : index
    %5 = vector.load %arg0[%c89, %c0_5] : memref<96x128xf32, #tpu.memory_space<vmem>>, vector<1x32xf32>
    %c90 = arith.constant 90 : index
    %c0_6 = arith.constant 0 : index
    %6 = vector.load %arg0[%c90, %c0_6] : memref<96x128xf32, #tpu.memory_space<vmem>>, vector<1x32xf32>
    %c91 = arith.constant 91 : index
    %c0_7 = arith.constant 0 : index
    %7 = vector.load %arg0[%c91, %c0_7] : memref<96x128xf32, #tpu.memory_space<vmem>>, vector<1x32xf32>
    %c92 = arith.constant 92 : index
    %c0_8 = arith.constant 0 : index
    %8 = vector.load %arg0[%c92, %c0_8] : memref<96x128xf32, #tpu.memory_space<vmem>>, vector<1x32xf32>
    %c93 = arith.constant 93 : index
    %c0_9 = arith.constant 0 : index
    %9 = vector.load %arg0[%c93, %c0_9] : memref<96x128xf32, #tpu.memory_space<vmem>>, vector<1x32xf32>
    %c94 = arith.constant 94 : index
    %c0_10 = arith.constant 0 : index
    %10 = vector.load %arg0[%c94, %c0_10] : memref<96x128xf32, #tpu.memory_space<vmem>>, vector<1x1xf32>
    %cst = arith.constant dense<0.000000e+00> : vector<8x96xf32>
    %11 = tpu.matmul %0, %1, %cst {dimension_numbers = #tpu.dot_dimension_numbers<[1], [0], [0], [1], [0, 0, 1, 1], [], []>} : vector<8x16xf32>, vector<16x96xf32>, vector<8x96xf32> -> vector<8x96xf32>
    %12 = vector.broadcast %4 : vector<1x96xf32> to vector<8x96xf32>
    %13 = arith.addf %11, %12 : vector<8x96xf32>
    %14 = vector.extract_strided_slice %13 {offsets = [0, 0], sizes = [8, 32], strides = [1, 1]} : vector<8x96xf32> to vector<8x32xf32>
    %15 = vector.extract_strided_slice %13 {offsets = [0, 32], sizes = [8, 32], strides = [1, 1]} : vector<8x96xf32> to vector<8x32xf32>
    %16 = vector.extract_strided_slice %13 {offsets = [0, 64], sizes = [8, 32], strides = [1, 1]} : vector<8x96xf32> to vector<8x32xf32>
    %17 = vector.extract_strided_slice %14 {offsets = [0, 0], sizes = [1, 32], strides = [1, 1]} : vector<8x32xf32> to vector<1x32xf32>
    %18 = arith.negf %17 : vector<1x32xf32>
    %19 = math.exp %18 : vector<1x32xf32>
    %cst_11 = arith.constant 1.000000e+00 : f32
    %20 = vector.broadcast %cst_11 : f32 to vector<1x32xf32>
    %21 = arith.addf %20, %19 : vector<1x32xf32>
    %22 = arith.divf %20, %21 : vector<1x32xf32>
    %23 = vector.extract_strided_slice %15 {offsets = [0, 0], sizes = [1, 32], strides = [1, 1]} : vector<8x32xf32> to vector<1x32xf32>
    %24 = arith.negf %23 : vector<1x32xf32>
    %25 = math.exp %24 : vector<1x32xf32>
    %cst_12 = arith.constant 1.000000e+00 : f32
    %26 = vector.broadcast %cst_12 : f32 to vector<1x32xf32>
    %27 = arith.addf %26, %25 : vector<1x32xf32>
    %28 = arith.divf %26, %27 : vector<1x32xf32>
    %29 = vector.extract_strided_slice %16 {offsets = [0, 0], sizes = [1, 32], strides = [1, 1]} : vector<8x32xf32> to vector<1x32xf32>
    %30 = arith.mulf %22, %5 : vector<1x32xf32>
    %31 = arith.addf %29, %30 : vector<1x32xf32>
    %32 = math.tanh %31 : vector<1x32xf32>
    %cst_13 = arith.constant 1.000000e+00 : f32
    %33 = vector.broadcast %cst_13 : f32 to vector<1x32xf32>
    %34 = arith.subf %33, %28 : vector<1x32xf32>
    %35 = arith.mulf %34, %32 : vector<1x32xf32>
    %cst_14 = arith.constant dense<0.000000e+00> : vector<1x96xf32>
    %36 = tpu.matmul %35, %2, %cst_14 {dimension_numbers = #tpu.dot_dimension_numbers<[1], [0], [0], [1], [0, 0, 1, 1], [], []>} : vector<1x32xf32>, vector<32x96xf32>, vector<1x96xf32> -> vector<1x96xf32>
    %37 = vector.extract_strided_slice %14 {offsets = [1, 0], sizes = [1, 32], strides = [1, 1]} : vector<8x32xf32> to vector<1x32xf32>
    %38 = vector.extract_strided_slice %36 {offsets = [0, 0], sizes = [1, 32], strides = [1, 1]} : vector<1x96xf32> to vector<1x32xf32>
    %39 = arith.addf %37, %38 : vector<1x32xf32>
    %40 = arith.negf %39 : vector<1x32xf32>
    %41 = math.exp %40 : vector<1x32xf32>
    %cst_15 = arith.constant 1.000000e+00 : f32
    %42 = vector.broadcast %cst_15 : f32 to vector<1x32xf32>
    %43 = arith.addf %42, %41 : vector<1x32xf32>
    %44 = arith.divf %42, %43 : vector<1x32xf32>
    %45 = vector.extract_strided_slice %15 {offsets = [1, 0], sizes = [1, 32], strides = [1, 1]} : vector<8x32xf32> to vector<1x32xf32>
    %46 = vector.extract_strided_slice %36 {offsets = [0, 32], sizes = [1, 32], strides = [1, 1]} : vector<1x96xf32> to vector<1x32xf32>
    %47 = arith.addf %45, %46 : vector<1x32xf32>
    %48 = arith.negf %47 : vector<1x32xf32>
    %49 = math.exp %48 : vector<1x32xf32>
    %cst_16 = arith.constant 1.000000e+00 : f32
    %50 = vector.broadcast %cst_16 : f32 to vector<1x32xf32>
    %51 = arith.addf %50, %49 : vector<1x32xf32>
    %52 = arith.divf %50, %51 : vector<1x32xf32>
    %53 = vector.extract_strided_slice %16 {offsets = [1, 0], sizes = [1, 32], strides = [1, 1]} : vector<8x32xf32> to vector<1x32xf32>
    %54 = vector.extract_strided_slice %36 {offsets = [0, 64], sizes = [1, 32], strides = [1, 1]} : vector<1x96xf32> to vector<1x32xf32>
    %55 = arith.addf %54, %5 : vector<1x32xf32>
    %56 = arith.mulf %44, %55 : vector<1x32xf32>
    %57 = arith.addf %53, %56 : vector<1x32xf32>
    %58 = math.tanh %57 : vector<1x32xf32>
    %cst_17 = arith.constant 1.000000e+00 : f32
    %59 = vector.broadcast %cst_17 : f32 to vector<1x32xf32>
    %60 = arith.subf %59, %52 : vector<1x32xf32>
    %61 = arith.mulf %60, %58 : vector<1x32xf32>
    %62 = arith.mulf %52, %35 : vector<1x32xf32>
    %63 = arith.addf %61, %62 : vector<1x32xf32>
    %cst_18 = arith.constant dense<0.000000e+00> : vector<1x96xf32>
    %64 = tpu.matmul %63, %2, %cst_18 {dimension_numbers = #tpu.dot_dimension_numbers<[1], [0], [0], [1], [0, 0, 1, 1], [], []>} : vector<1x32xf32>, vector<32x96xf32>, vector<1x96xf32> -> vector<1x96xf32>
    %65 = vector.extract_strided_slice %14 {offsets = [2, 0], sizes = [1, 32], strides = [1, 1]} : vector<8x32xf32> to vector<1x32xf32>
    %66 = vector.extract_strided_slice %64 {offsets = [0, 0], sizes = [1, 32], strides = [1, 1]} : vector<1x96xf32> to vector<1x32xf32>
    %67 = arith.addf %65, %66 : vector<1x32xf32>
    %68 = arith.negf %67 : vector<1x32xf32>
    %69 = math.exp %68 : vector<1x32xf32>
    %cst_19 = arith.constant 1.000000e+00 : f32
    %70 = vector.broadcast %cst_19 : f32 to vector<1x32xf32>
    %71 = arith.addf %70, %69 : vector<1x32xf32>
    %72 = arith.divf %70, %71 : vector<1x32xf32>
    %73 = vector.extract_strided_slice %15 {offsets = [2, 0], sizes = [1, 32], strides = [1, 1]} : vector<8x32xf32> to vector<1x32xf32>
    %74 = vector.extract_strided_slice %64 {offsets = [0, 32], sizes = [1, 32], strides = [1, 1]} : vector<1x96xf32> to vector<1x32xf32>
    %75 = arith.addf %73, %74 : vector<1x32xf32>
    %76 = arith.negf %75 : vector<1x32xf32>
    %77 = math.exp %76 : vector<1x32xf32>
    %cst_20 = arith.constant 1.000000e+00 : f32
    %78 = vector.broadcast %cst_20 : f32 to vector<1x32xf32>
    %79 = arith.addf %78, %77 : vector<1x32xf32>
    %80 = arith.divf %78, %79 : vector<1x32xf32>
    %81 = vector.extract_strided_slice %16 {offsets = [2, 0], sizes = [1, 32], strides = [1, 1]} : vector<8x32xf32> to vector<1x32xf32>
    %82 = vector.extract_strided_slice %64 {offsets = [0, 64], sizes = [1, 32], strides = [1, 1]} : vector<1x96xf32> to vector<1x32xf32>
    %83 = arith.addf %82, %5 : vector<1x32xf32>
    %84 = arith.mulf %72, %83 : vector<1x32xf32>
    %85 = arith.addf %81, %84 : vector<1x32xf32>
    %86 = math.tanh %85 : vector<1x32xf32>
    %cst_21 = arith.constant 1.000000e+00 : f32
    %87 = vector.broadcast %cst_21 : f32 to vector<1x32xf32>
    %88 = arith.subf %87, %80 : vector<1x32xf32>
    %89 = arith.mulf %88, %86 : vector<1x32xf32>
    %90 = arith.mulf %80, %63 : vector<1x32xf32>
    %91 = arith.addf %89, %90 : vector<1x32xf32>
    %cst_22 = arith.constant dense<0.000000e+00> : vector<1x96xf32>
    %92 = tpu.matmul %91, %2, %cst_22 {dimension_numbers = #tpu.dot_dimension_numbers<[1], [0], [0], [1], [0, 0, 1, 1], [], []>} : vector<1x32xf32>, vector<32x96xf32>, vector<1x96xf32> -> vector<1x96xf32>
    %93 = vector.extract_strided_slice %14 {offsets = [3, 0], sizes = [1, 32], strides = [1, 1]} : vector<8x32xf32> to vector<1x32xf32>
    %94 = vector.extract_strided_slice %92 {offsets = [0, 0], sizes = [1, 32], strides = [1, 1]} : vector<1x96xf32> to vector<1x32xf32>
    %95 = arith.addf %93, %94 : vector<1x32xf32>
    %96 = arith.negf %95 : vector<1x32xf32>
    %97 = math.exp %96 : vector<1x32xf32>
    %cst_23 = arith.constant 1.000000e+00 : f32
    %98 = vector.broadcast %cst_23 : f32 to vector<1x32xf32>
    %99 = arith.addf %98, %97 : vector<1x32xf32>
    %100 = arith.divf %98, %99 : vector<1x32xf32>
    %101 = vector.extract_strided_slice %15 {offsets = [3, 0], sizes = [1, 32], strides = [1, 1]} : vector<8x32xf32> to vector<1x32xf32>
    %102 = vector.extract_strided_slice %92 {offsets = [0, 32], sizes = [1, 32], strides = [1, 1]} : vector<1x96xf32> to vector<1x32xf32>
    %103 = arith.addf %101, %102 : vector<1x32xf32>
    %104 = arith.negf %103 : vector<1x32xf32>
    %105 = math.exp %104 : vector<1x32xf32>
    %cst_24 = arith.constant 1.000000e+00 : f32
    %106 = vector.broadcast %cst_24 : f32 to vector<1x32xf32>
    %107 = arith.addf %106, %105 : vector<1x32xf32>
    %108 = arith.divf %106, %107 : vector<1x32xf32>
    %109 = vector.extract_strided_slice %16 {offsets = [3, 0], sizes = [1, 32], strides = [1, 1]} : vector<8x32xf32> to vector<1x32xf32>
    %110 = vector.extract_strided_slice %92 {offsets = [0, 64], sizes = [1, 32], strides = [1, 1]} : vector<1x96xf32> to vector<1x32xf32>
    %111 = arith.addf %110, %5 : vector<1x32xf32>
    %112 = arith.mulf %100, %111 : vector<1x32xf32>
    %113 = arith.addf %109, %112 : vector<1x32xf32>
    %114 = math.tanh %113 : vector<1x32xf32>
    %cst_25 = arith.constant 1.000000e+00 : f32
    %115 = vector.broadcast %cst_25 : f32 to vector<1x32xf32>
    %116 = arith.subf %115, %108 : vector<1x32xf32>
    %117 = arith.mulf %116, %114 : vector<1x32xf32>
    %118 = arith.mulf %108, %91 : vector<1x32xf32>
    %119 = arith.addf %117, %118 : vector<1x32xf32>
    %cst_26 = arith.constant dense<0.000000e+00> : vector<1x96xf32>
    %120 = tpu.matmul %119, %2, %cst_26 {dimension_numbers = #tpu.dot_dimension_numbers<[1], [0], [0], [1], [0, 0, 1, 1], [], []>} : vector<1x32xf32>, vector<32x96xf32>, vector<1x96xf32> -> vector<1x96xf32>
    %121 = vector.extract_strided_slice %14 {offsets = [4, 0], sizes = [1, 32], strides = [1, 1]} : vector<8x32xf32> to vector<1x32xf32>
    %122 = vector.extract_strided_slice %120 {offsets = [0, 0], sizes = [1, 32], strides = [1, 1]} : vector<1x96xf32> to vector<1x32xf32>
    %123 = arith.addf %121, %122 : vector<1x32xf32>
    %124 = arith.negf %123 : vector<1x32xf32>
    %125 = math.exp %124 : vector<1x32xf32>
    %cst_27 = arith.constant 1.000000e+00 : f32
    %126 = vector.broadcast %cst_27 : f32 to vector<1x32xf32>
    %127 = arith.addf %126, %125 : vector<1x32xf32>
    %128 = arith.divf %126, %127 : vector<1x32xf32>
    %129 = vector.extract_strided_slice %15 {offsets = [4, 0], sizes = [1, 32], strides = [1, 1]} : vector<8x32xf32> to vector<1x32xf32>
    %130 = vector.extract_strided_slice %120 {offsets = [0, 32], sizes = [1, 32], strides = [1, 1]} : vector<1x96xf32> to vector<1x32xf32>
    %131 = arith.addf %129, %130 : vector<1x32xf32>
    %132 = arith.negf %131 : vector<1x32xf32>
    %133 = math.exp %132 : vector<1x32xf32>
    %cst_28 = arith.constant 1.000000e+00 : f32
    %134 = vector.broadcast %cst_28 : f32 to vector<1x32xf32>
    %135 = arith.addf %134, %133 : vector<1x32xf32>
    %136 = arith.divf %134, %135 : vector<1x32xf32>
    %137 = vector.extract_strided_slice %16 {offsets = [4, 0], sizes = [1, 32], strides = [1, 1]} : vector<8x32xf32> to vector<1x32xf32>
    %138 = vector.extract_strided_slice %120 {offsets = [0, 64], sizes = [1, 32], strides = [1, 1]} : vector<1x96xf32> to vector<1x32xf32>
    %139 = arith.addf %138, %5 : vector<1x32xf32>
    %140 = arith.mulf %128, %139 : vector<1x32xf32>
    %141 = arith.addf %137, %140 : vector<1x32xf32>
    %142 = math.tanh %141 : vector<1x32xf32>
    %cst_29 = arith.constant 1.000000e+00 : f32
    %143 = vector.broadcast %cst_29 : f32 to vector<1x32xf32>
    %144 = arith.subf %143, %136 : vector<1x32xf32>
    %145 = arith.mulf %144, %142 : vector<1x32xf32>
    %146 = arith.mulf %136, %119 : vector<1x32xf32>
    %147 = arith.addf %145, %146 : vector<1x32xf32>
    %cst_30 = arith.constant dense<0.000000e+00> : vector<1x96xf32>
    %148 = tpu.matmul %147, %2, %cst_30 {dimension_numbers = #tpu.dot_dimension_numbers<[1], [0], [0], [1], [0, 0, 1, 1], [], []>} : vector<1x32xf32>, vector<32x96xf32>, vector<1x96xf32> -> vector<1x96xf32>
    %149 = vector.extract_strided_slice %14 {offsets = [5, 0], sizes = [1, 32], strides = [1, 1]} : vector<8x32xf32> to vector<1x32xf32>
    %150 = vector.extract_strided_slice %148 {offsets = [0, 0], sizes = [1, 32], strides = [1, 1]} : vector<1x96xf32> to vector<1x32xf32>
    %151 = arith.addf %149, %150 : vector<1x32xf32>
    %152 = arith.negf %151 : vector<1x32xf32>
    %153 = math.exp %152 : vector<1x32xf32>
    %cst_31 = arith.constant 1.000000e+00 : f32
    %154 = vector.broadcast %cst_31 : f32 to vector<1x32xf32>
    %155 = arith.addf %154, %153 : vector<1x32xf32>
    %156 = arith.divf %154, %155 : vector<1x32xf32>
    %157 = vector.extract_strided_slice %15 {offsets = [5, 0], sizes = [1, 32], strides = [1, 1]} : vector<8x32xf32> to vector<1x32xf32>
    %158 = vector.extract_strided_slice %148 {offsets = [0, 32], sizes = [1, 32], strides = [1, 1]} : vector<1x96xf32> to vector<1x32xf32>
    %159 = arith.addf %157, %158 : vector<1x32xf32>
    %160 = arith.negf %159 : vector<1x32xf32>
    %161 = math.exp %160 : vector<1x32xf32>
    %cst_32 = arith.constant 1.000000e+00 : f32
    %162 = vector.broadcast %cst_32 : f32 to vector<1x32xf32>
    %163 = arith.addf %162, %161 : vector<1x32xf32>
    %164 = arith.divf %162, %163 : vector<1x32xf32>
    %165 = vector.extract_strided_slice %16 {offsets = [5, 0], sizes = [1, 32], strides = [1, 1]} : vector<8x32xf32> to vector<1x32xf32>
    %166 = vector.extract_strided_slice %148 {offsets = [0, 64], sizes = [1, 32], strides = [1, 1]} : vector<1x96xf32> to vector<1x32xf32>
    %167 = arith.addf %166, %5 : vector<1x32xf32>
    %168 = arith.mulf %156, %167 : vector<1x32xf32>
    %169 = arith.addf %165, %168 : vector<1x32xf32>
    %170 = math.tanh %169 : vector<1x32xf32>
    %cst_33 = arith.constant 1.000000e+00 : f32
    %171 = vector.broadcast %cst_33 : f32 to vector<1x32xf32>
    %172 = arith.subf %171, %164 : vector<1x32xf32>
    %173 = arith.mulf %172, %170 : vector<1x32xf32>
    %174 = arith.mulf %164, %147 : vector<1x32xf32>
    %175 = arith.addf %173, %174 : vector<1x32xf32>
    %cst_34 = arith.constant dense<0.000000e+00> : vector<1x96xf32>
    %176 = tpu.matmul %175, %2, %cst_34 {dimension_numbers = #tpu.dot_dimension_numbers<[1], [0], [0], [1], [0, 0, 1, 1], [], []>} : vector<1x32xf32>, vector<32x96xf32>, vector<1x96xf32> -> vector<1x96xf32>
    %177 = vector.extract_strided_slice %14 {offsets = [6, 0], sizes = [1, 32], strides = [1, 1]} : vector<8x32xf32> to vector<1x32xf32>
    %178 = vector.extract_strided_slice %176 {offsets = [0, 0], sizes = [1, 32], strides = [1, 1]} : vector<1x96xf32> to vector<1x32xf32>
    %179 = arith.addf %177, %178 : vector<1x32xf32>
    %180 = arith.negf %179 : vector<1x32xf32>
    %181 = math.exp %180 : vector<1x32xf32>
    %cst_35 = arith.constant 1.000000e+00 : f32
    %182 = vector.broadcast %cst_35 : f32 to vector<1x32xf32>
    %183 = arith.addf %182, %181 : vector<1x32xf32>
    %184 = arith.divf %182, %183 : vector<1x32xf32>
    %185 = vector.extract_strided_slice %15 {offsets = [6, 0], sizes = [1, 32], strides = [1, 1]} : vector<8x32xf32> to vector<1x32xf32>
    %186 = vector.extract_strided_slice %176 {offsets = [0, 32], sizes = [1, 32], strides = [1, 1]} : vector<1x96xf32> to vector<1x32xf32>
    %187 = arith.addf %185, %186 : vector<1x32xf32>
    %188 = arith.negf %187 : vector<1x32xf32>
    %189 = math.exp %188 : vector<1x32xf32>
    %cst_36 = arith.constant 1.000000e+00 : f32
    %190 = vector.broadcast %cst_36 : f32 to vector<1x32xf32>
    %191 = arith.addf %190, %189 : vector<1x32xf32>
    %192 = arith.divf %190, %191 : vector<1x32xf32>
    %193 = vector.extract_strided_slice %16 {offsets = [6, 0], sizes = [1, 32], strides = [1, 1]} : vector<8x32xf32> to vector<1x32xf32>
    %194 = vector.extract_strided_slice %176 {offsets = [0, 64], sizes = [1, 32], strides = [1, 1]} : vector<1x96xf32> to vector<1x32xf32>
    %195 = arith.addf %194, %5 : vector<1x32xf32>
    %196 = arith.mulf %184, %195 : vector<1x32xf32>
    %197 = arith.addf %193, %196 : vector<1x32xf32>
    %198 = math.tanh %197 : vector<1x32xf32>
    %cst_37 = arith.constant 1.000000e+00 : f32
    %199 = vector.broadcast %cst_37 : f32 to vector<1x32xf32>
    %200 = arith.subf %199, %192 : vector<1x32xf32>
    %201 = arith.mulf %200, %198 : vector<1x32xf32>
    %202 = arith.mulf %192, %175 : vector<1x32xf32>
    %203 = arith.addf %201, %202 : vector<1x32xf32>
    %cst_38 = arith.constant dense<0.000000e+00> : vector<1x96xf32>
    %204 = tpu.matmul %203, %2, %cst_38 {dimension_numbers = #tpu.dot_dimension_numbers<[1], [0], [0], [1], [0, 0, 1, 1], [], []>} : vector<1x32xf32>, vector<32x96xf32>, vector<1x96xf32> -> vector<1x96xf32>
    %205 = vector.extract_strided_slice %14 {offsets = [7, 0], sizes = [1, 32], strides = [1, 1]} : vector<8x32xf32> to vector<1x32xf32>
    %206 = vector.extract_strided_slice %204 {offsets = [0, 0], sizes = [1, 32], strides = [1, 1]} : vector<1x96xf32> to vector<1x32xf32>
    %207 = arith.addf %205, %206 : vector<1x32xf32>
    %208 = arith.negf %207 : vector<1x32xf32>
    %209 = math.exp %208 : vector<1x32xf32>
    %cst_39 = arith.constant 1.000000e+00 : f32
    %210 = vector.broadcast %cst_39 : f32 to vector<1x32xf32>
    %211 = arith.addf %210, %209 : vector<1x32xf32>
    %212 = arith.divf %210, %211 : vector<1x32xf32>
    %213 = vector.extract_strided_slice %15 {offsets = [7, 0], sizes = [1, 32], strides = [1, 1]} : vector<8x32xf32> to vector<1x32xf32>
    %214 = vector.extract_strided_slice %204 {offsets = [0, 32], sizes = [1, 32], strides = [1, 1]} : vector<1x96xf32> to vector<1x32xf32>
    %215 = arith.addf %213, %214 : vector<1x32xf32>
    %216 = arith.negf %215 : vector<1x32xf32>
    %217 = math.exp %216 : vector<1x32xf32>
    %cst_40 = arith.constant 1.000000e+00 : f32
    %218 = vector.broadcast %cst_40 : f32 to vector<1x32xf32>
    %219 = arith.addf %218, %217 : vector<1x32xf32>
    %220 = arith.divf %218, %219 : vector<1x32xf32>
    %221 = vector.extract_strided_slice %16 {offsets = [7, 0], sizes = [1, 32], strides = [1, 1]} : vector<8x32xf32> to vector<1x32xf32>
    %222 = vector.extract_strided_slice %204 {offsets = [0, 64], sizes = [1, 32], strides = [1, 1]} : vector<1x96xf32> to vector<1x32xf32>
    %223 = arith.addf %222, %5 : vector<1x32xf32>
    %224 = arith.mulf %212, %223 : vector<1x32xf32>
    %225 = arith.addf %221, %224 : vector<1x32xf32>
    %226 = math.tanh %225 : vector<1x32xf32>
    %cst_41 = arith.constant 1.000000e+00 : f32
    %227 = vector.broadcast %cst_41 : f32 to vector<1x32xf32>
    %228 = arith.subf %227, %220 : vector<1x32xf32>
    %229 = arith.mulf %228, %226 : vector<1x32xf32>
    %230 = arith.mulf %220, %203 : vector<1x32xf32>
    %231 = arith.addf %229, %230 : vector<1x32xf32>
    %232 = tpu.concatenate %35, %63, %91, %119, %147, %175, %203, %231 in 0 : vector<1x32xf32>, vector<1x32xf32>, vector<1x32xf32>, vector<1x32xf32>, vector<1x32xf32>, vector<1x32xf32>, vector<1x32xf32>, vector<1x32xf32> -> vector<8x32xf32>
    %cst_42 = arith.constant dense<0.000000e+00> : vector<8x32xf32>
    %233 = tpu.matmul %232, %3, %cst_42 {dimension_numbers = #tpu.dot_dimension_numbers<[1], [0], [0], [1], [0, 0, 1, 1], [], []>} : vector<8x32xf32>, vector<32x32xf32>, vector<8x32xf32> -> vector<8x32xf32>
    %234 = vector.broadcast %6 : vector<1x32xf32> to vector<8x32xf32>
    %235 = arith.addf %233, %234 : vector<8x32xf32>
    %cst_43 = arith.constant dense<0.000000e+00> : vector<32xf32>
    %236 = vector.multi_reduction <add>, %235, %cst_43 [0] : vector<8x32xf32> to vector<32xf32>
    %237 = vector.shape_cast %236 : vector<32xf32> to vector<1x32xf32>
    %cst_44 = arith.constant 8.000000e+00 : f32
    %238 = vector.broadcast %cst_44 : f32 to vector<1x32xf32>
    %239 = arith.divf %237, %238 : vector<1x32xf32>
    %240 = vector.broadcast %239 : vector<1x32xf32> to vector<8x32xf32>
    %241 = arith.subf %235, %240 : vector<8x32xf32>
    %242 = arith.mulf %241, %241 : vector<8x32xf32>
    %cst_45 = arith.constant dense<0.000000e+00> : vector<32xf32>
    %243 = vector.multi_reduction <add>, %242, %cst_45 [0] : vector<8x32xf32> to vector<32xf32>
    %244 = vector.shape_cast %243 : vector<32xf32> to vector<1x32xf32>
    %cst_46 = arith.constant 8.000000e+00 : f32
    %245 = vector.broadcast %cst_46 : f32 to vector<1x32xf32>
    %246 = arith.divf %244, %245 : vector<1x32xf32>
    %247 = vector.broadcast %239 : vector<1x32xf32> to vector<8x32xf32>
    %248 = arith.subf %235, %247 : vector<8x32xf32>
    %cst_47 = arith.constant 9.99999974E-6 : f32
    %249 = vector.broadcast %cst_47 : f32 to vector<1x32xf32>
    %250 = arith.addf %246, %249 : vector<1x32xf32>
    %251 = math.rsqrt %250 : vector<1x32xf32>
    %252 = vector.broadcast %251 : vector<1x32xf32> to vector<8x32xf32>
    %253 = arith.mulf %248, %252 : vector<8x32xf32>
    %254 = vector.broadcast %7 : vector<1x32xf32> to vector<8x32xf32>
    %255 = arith.mulf %254, %253 : vector<8x32xf32>
    %256 = vector.broadcast %8 : vector<1x32xf32> to vector<8x32xf32>
    %257 = arith.addf %255, %256 : vector<8x32xf32>
    %cst_48 = arith.constant 0.000000e+00 : f32
    %258 = vector.broadcast %cst_48 : f32 to vector<8x32xf32>
    %259 = arith.maximumf %257, %258 : vector<8x32xf32>
    %260 = vector.broadcast %9 : vector<1x32xf32> to vector<8x32xf32>
    %261 = arith.mulf %259, %260 : vector<8x32xf32>
    %cst_49 = arith.constant dense<0.000000e+00> : vector<8xf32>
    %262 = vector.multi_reduction <add>, %261, %cst_49 [1] : vector<8x32xf32> to vector<8xf32>
    %263 = vector.shape_cast %262 : vector<8xf32> to vector<8x1xf32>
    %264 = vector.broadcast %10 : vector<1x1xf32> to vector<8x1xf32>
    %265 = arith.addf %263, %264 : vector<8x1xf32>
    %266 = arith.negf %265 : vector<8x1xf32>
    %267 = math.exp %266 : vector<8x1xf32>
    %cst_50 = arith.constant 1.000000e+00 : f32
    %268 = vector.broadcast %cst_50 : f32 to vector<8x1xf32>
    %269 = arith.addf %268, %267 : vector<8x1xf32>
    %270 = arith.divf %268, %269 : vector<8x1xf32>
    %cst_51 = arith.constant 5.000000e-01 : f32
    %271 = vector.broadcast %cst_51 : f32 to vector<8x1xf32>
    %272 = arith.subf %270, %271 : vector<8x1xf32>
    %273 = arith.mulf %272, %272 : vector<8x1xf32>
    %274 = vector.shape_cast %273 : vector<8x1xf32> to vector<1x8x1xf32>
    %cst_52 = arith.constant dense<0.000000e+00> : vector<1xf32>
    %275 = vector.multi_reduction <add>, %274, %cst_52 [1, 2] : vector<1x8x1xf32> to vector<1xf32>
    %276 = vector.shape_cast %275 : vector<1xf32> to vector<1x1x1xf32>
    %277 = vector.extract %276[0, 0, 0] : f32 from vector<1x1x1xf32>
    %cst_53 = arith.constant 8.000000e+00 : f32
    %278 = arith.divf %277, %cst_53 : f32
    %279 = vector.broadcast %278 : f32 to vector<1x1xf32>
    %280 = tpu.iota {dimensions = array<i32: 1>} : vector<8x128xi32>
    %c0_i32 = arith.constant 0 : i32
    %281 = vector.broadcast %c0_i32 : i32 to vector<8x128xi32>
    %282 = arith.cmpi eq, %280, %281 : vector<8x128xi32>
    %c1_i32 = arith.constant 1 : i32
    %283 = vector.broadcast %c1_i32 : i32 to vector<8x128xi32>
    %284 = arith.cmpi eq, %280, %283 : vector<8x128xi32>
    %cst_54 = arith.constant 0.000000e+00 : f32
    %285 = vector.shape_cast %279 : vector<1x1xf32> to vector<1x1xf32>
    %286 = vector.broadcast %285 : vector<1x1xf32> to vector<8x128xf32>
    %287 = vector.broadcast %cst_54 : f32 to vector<8x128xf32>
    %288 = arith.select %284, %286, %287 : vector<8x128xi1>, vector<8x128xf32>
    %289 = vector.shape_cast %270 : vector<8x1xf32> to vector<8x1xf32>
    %290 = vector.broadcast %289 : vector<8x1xf32> to vector<8x128xf32>
    %291 = arith.select %282, %290, %288 : vector<8x128xi1>, vector<8x128xf32>
    %c0_55 = arith.constant 0 : index
    %c0_56 = arith.constant 0 : index
    %292 = vector.load %arg1[%c0_55, %c0_56] : memref<8x128xf32, #tpu.memory_space<vmem>>, vector<8x128xf32>
    tpu.vector_store %arg1[%c0_55, %c0_56], %291 {strides = array<i32>} : memref<8x128xf32, #tpu.memory_space<vmem>>, vector<8x128xf32>,
    return
  }
}

</mosaic_0001>

<bundles_post_ra>
// kernel: forward.1
= control target key start
LH: loop header
LB: loop body
LE: loop exit
PB: predicated region body
PF: predicated region fallthrough
CT: control target
= control target key end

     0   :  { %6 = vsyncpa [#allocation3], 0  ;;  %s875_s9 = smov [#allocation2]   ;;  %s876_s11 = smov 128   ;;  %s978_s0 = inlined_call_operand.hbm [shape: f32[96,128], index: 0, kind: input, shape index: {}]   ;;  %s979_s1 = inlined_call_operand.vmem [shape: f32[8,128], index: 1, kind: output, shape index: {}]  }
   0x1   :  { %s11_s8 = sshll.u32 %s978_s0, 4  ;;  %s13_s10 = sshll.u32 %s875_s9, 4  ;;  %s12_s8 = int_to_ptr.hbm [resolvable:$true] %s11_s8  ;;  %s14_s10 = int_to_ptr.vmem [resolvable:$true] %s13_s10 }
   0x2   :  { %s877_s12 = smov 8  }
   0x3   :  { %19 = dma.hbm_to_vmem [thread:$0]  %s12_s8, 1536, %s14_s10, [#allocation3], %s876_s11, %s876_s11, %s877_s12  }
   0x4   :  { %873 = dma.done.wait [#allocation3], 1536  }
   0x5   :  { %874 = vsyncadd [#allocation3], 4294965760  ;;  %v26_v0 = vld [vmem:[#allocation2 + $0x10] sm:$0xff]  ;;  %v25_v1 = vld [vmem:[#allocation2 + $0x8] sm:$0xff]  ;;  %vm43_vm0 = vcmask 130048   ;;  %s878_s0 = smov 64  }
   0x6   :  { %61 = vmatpush.msra.mxu0 %v26_v0  ;;  %v24_v2 = vld [vmem:[#allocation2] sm:$0xff]  ;;  %v787_v3 = vld [vmem:[#allocation2 + $0x58] ss:$0 sm:$0xff]  ;;  %v36_v16 = vld [vmem:[#allocation2 + $0x59] sm:$0x1]  ;;  %s879_s13 = smov 96  }
   0x7   :  { %v30_v24 = vld [vmem:[#allocation2 + $0x30] sm:$0xff]  ;;  %v29_v25 = vld [vmem:[#allocation2 + $0x28] sm:$0xff]  ;;  %v28_v26 = vld [vmem:[#allocation2 + $0x20] sm:$0xff]  ;;  %vm102_vm5 = vcmask 261120   ;;  %vm607_vm14 = vcmask 1040384   ;;  %vm609_vm15 = vcmask 1041408  }
   0x8   :  { %62 = vmatpush.msra.mxu0 %v25_v1  ;;  %117 = vmatpush.msra.mxu1 %v30_v24  ;;  %v27_v27 = vld [vmem:[#allocation2 + $0x18] sm:$0xff] }
   0x9   :  { %755 = vmatmul.msk.f32.vlgmr.msra.gmra.mxu0 %vm43_vm0, %v24_v2  ;;  %193 = vmatpush.msra.mxu2 %v30_v24 }
   0xa   :  { %265 = vmatpush.msra.mxu3 %v30_v24  ;;  %337 = vmatpush.msrb.mxu0 %v30_v24 }
   0xb   :  { %118 = vmatpush.msra.mxu1 %v29_v25  ;;  %194 = vmatpush.msra.mxu2 %v29_v25 }
   0xc   :  { %266 = vmatpush.msra.mxu3 %v29_v25  ;;  %338 = vmatpush.msrb.mxu0 %v29_v25 }
   0xd   :  { %119 = vmatpush.msra.mxu1 %v28_v26  ;;  %195 = vmatpush.msra.mxu2 %v28_v26 }
   0xe   :  { %267 = vmatpush.msra.mxu3 %v28_v26  ;;  %339 = vmatpush.msrb.mxu0 %v28_v26 }
   0xf   :  { %120 = vmatpush.msra.mxu1 %v27_v27  ;;  %196 = vmatpush.msra.mxu2 %v27_v27 }
  0x10   :  { %268 = vmatpush.msra.mxu3 %v27_v27  ;;  %340 = vmatpush.msrb.mxu0 %v27_v27 }
  0x11   :  { %409 = vmatpush.msrb.mxu1 %v30_v24  ;;  %481 = vmatpush.msrb.mxu2 %v30_v24 }
  0x12   :  { %553 = vmatpush.msrb.mxu3 %v30_v24 }
  0x13   :  { %410 = vmatpush.msrb.mxu1 %v29_v25  ;;  %482 = vmatpush.msrb.mxu2 %v29_v25 }
  0x14   :  { %554 = vmatpush.msrb.mxu3 %v29_v25 }
  0x15   :  { %411 = vmatpush.msrb.mxu1 %v28_v26  ;;  %483 = vmatpush.msrb.mxu2 %v28_v26 }
  0x16   :  { %555 = vmatpush.msrb.mxu3 %v28_v26 }
  0x17   :  { %412 = vmatpush.msrb.mxu1 %v27_v27  ;;  %484 = vmatpush.msrb.mxu2 %v27_v27 }
  0x18   :  { %556 = vmatpush.msrb.mxu3 %v27_v27 }
  0x86   :  { %v64_v4 = vpop.f32.mrf.mxu0 }
  0x87   :  { %v895_v5 = vadd.f32 %v787_v3, %v64_v4 }
  0x89   :  { %v756_v6 = vmul.f32 -1.442695, %v895_v5 }
  0x8b   :  { %793 = vpow2.f32 %v756_v6 }
  0x91   :  { %v794_v7 = vpop.eup %793 }
  0x92   :  { %v70_v8 = vadd.f32 1.0, %v794_v7 }
  0x94   :  { %795 = vrcp.f32 %v70_v8  ;;  %v82_v12 = vand.u32 2147483648, %v70_v8  ;;  %v80_v14 = vand.u32 2147483647, %v70_v8  ;;  %vm76_vm2 = vweird.f32 %v70_v8 }
  0x96   :  { %v83_v17 = vor.u32 1.1754944e-38, %v82_v12  ;;  %vm81_vm4 = vcmp.eq.f32.partialorder %v80_v14, 8.507059e+37 }
  0x9a   :  { %v796_v9 = vpop.eup %795 }
  0x9b   :  { %v72_v10 = vmul.f32 %v796_v9, %v70_v8  ;;  %vm77_vm1 = vweird.f32 %v796_v9 }
  0x9c   :  { %vm78_vm3 = vmor %vm76_vm2, %vm77_vm1 }
  0x9d   :  { %v73_v11 = vsub.f32 1.0, %v72_v10 }
  0x9f   :  { %v74_v13 = vmul.f32 %v796_v9, %v73_v11 }
  0xa1   :  { %v75_v15 = vadd.f32 %v796_v9, %v74_v13 }
  0xa3   :  { %v79_v18 = vsel %vm78_vm3, %v796_v9, %v75_v15 }
  0xa4   :  { %v84_v19 = vsel %vm81_vm4, %v83_v17, %v79_v18  ;;  %vm611_vm4 = vcmask 1042432  }
  0xa5   :  { %v86_v20 = vmul.f32 %v84_v19, %v36_v16  ;;  %v93_v28 = vsub.f32 1.0, %v84_v19 }
  0xa7   :  { %88 = vrot.lane.b32.xlu0 %v86_v20, %s878_s0 }
 0x119   :  { %v89_v21 = vpop.permute.xlu0 %88 }
 0x11a   :  { %v91_v22 = vadd.f32 %v89_v21, %v895_v5 }
 0x11c   :  { %797 = vtanh.f32 %v91_v22 }
 0x122   :  { %v798_v23 = vpop.eup %797 }
 0x123   :  { %95 = vrot.lane.b32.xlu0 %v798_v23, %s879_s13 }
 0x195   :  { %v96_v29 = vpop.permute.xlu0 %95 }
 0x196   :  { %v901_v30 = vmul.f32 %v96_v29, %v93_v28 }
 0x198   :  { %100 = vrot.lane.b32.xlu1 %v901_v30, %s879_s13  ;;  %v171_v56 = vrot.slane %v901_v30, 7 }
 0x1a0   :  { %149 = vrot.lane.b32.xlu1 %v36_v16, %s878_s0 }
 0x20a   :  { %v101_v31 = vpop.permute.xlu1 %100 }
 0x20b   :  { %757 = vmatmul.msk.f32.vlgmr.msra.gmra.mxu1 %vm102_vm5, %v101_v31 }
 0x212   :  { %v907_v32 = vpop.permute.xlu1 %149 }
 0x288   :  { %v122_v33 = vpop.f32.mrf.mxu1 }
 0x289   :  { %v152_v34 = vadd.f32 %v907_v32, %v122_v33  ;;  %v126_v36 = vrot.slane %v122_v33, 7 }
 0x28b   :  { %v154_v35 = vrot.slane %v152_v34, 7  ;;  %v128_v37 = vadd.f32 %v126_v36, %v895_v5 }
 0x28d   :  { %155 = vrot.lane.b32.xlu2 %v154_v35, %s878_s0  ;;  %v758_v38 = vmul.f32 -1.442695, %v128_v37 }
 0x28f   :  { %799 = vpow2.f32 %v758_v38 }
 0x295   :  { %v800_v39 = vpop.eup %799 }
 0x296   :  { %v132_v40 = vadd.f32 1.0, %v800_v39 }
 0x298   :  { %801 = vrcp.f32 %v132_v40  ;;  %v144_v46 = vand.u32 2147483648, %v132_v40  ;;  %vm138_vm7 = vweird.f32 %v132_v40  ;;  %v142_v47 = vand.u32 2147483647, %v132_v40 }
 0x29a   :  { %v145_v49 = vor.u32 1.1754944e-38, %v144_v46  ;;  %vm143_vm9 = vcmp.eq.f32.partialorder %v142_v47, 8.507059e+37 }
 0x29e   :  { %v802_v41 = vpop.eup %801 }
 0x29f   :  { %v134_v42 = vmul.f32 %v802_v41, %v132_v40  ;;  %vm139_vm6 = vweird.f32 %v802_v41 }
 0x2a0   :  { %vm140_vm8 = vmor %vm138_vm7, %vm139_vm6 }
 0x2a1   :  { %v135_v43 = vsub.f32 1.0, %v134_v42 }
 0x2a3   :  { %v136_v44 = vmul.f32 %v802_v41, %v135_v43 }
 0x2a5   :  { %v137_v45 = vadd.f32 %v802_v41, %v136_v44 }
 0x2a7   :  { %v141_v48 = vsel %vm140_vm8, %v802_v41, %v137_v45 }
 0x2a8   :  { %v146_v50 = vsel %vm143_vm9, %v145_v49, %v141_v48 }
 0x2a9   :  { %v165_v57 = vsub.f32 1.0, %v146_v50  ;;  %v173_v60 = vmul.f32 %v171_v56, %v146_v50 }
 0x2e7   :  { %v156_v51 = vpop.permute.xlu2 %155 }
 0x2e8   :  { %v158_v52 = vmul.f32 %v156_v51, %v146_v50 }
 0x2ea   :  { %160 = vrot.lane.b32.xlu2 %v158_v52, %s878_s0 }
 0x344   :  { %v161_v53 = vpop.permute.xlu2 %160 }
 0x345   :  { %v163_v54 = vadd.f32 %v161_v53, %v895_v5 }
 0x347   :  { %803 = vtanh.f32 %v163_v54 }
 0x34d   :  { %v804_v55 = vpop.eup %803 }
 0x34e   :  { %167 = vrot.lane.b32.xlu0 %v804_v55, %s879_s13 }
 0x3c0   :  { %v168_v58 = vpop.permute.xlu0 %167 }
 0x3c1   :  { %v170_v59 = vmul.f32 %v168_v58, %v165_v57 }
 0x3c3   :  { %v174_v61 = vadd.f32 %v173_v60, %v170_v59 }
 0x3c5   :  { %v176_v62 = vrot.slane %v174_v61, 1  ;;  %v243_v18 = vrot.slane %v174_v61, 7  ;;  %v608_v31 = vsel %vm607_vm14, %v901_v30, %v174_v61 }
 0x3c7   :  { %177 = vrot.lane.b32.xlu1 %v176_v62, %s879_s13 }
 0x439   :  { %v178_v63 = vpop.permute.xlu1 %177 }
 0x43a   :  { %759 = vmatmul.msk.f32.vlgmr.msra.gmra.mxu2 %vm102_vm5, %v178_v63 }
 0x4bd   :  { %v198_v0 = vpop.f32.mrf.mxu2 }
 0x4be   :  { %v202_v1 = vrot.slane %v198_v0, 6  ;;  %v224_v2 = vadd.f32 %v198_v0, %v907_v32 }
 0x4c0   :  { %v204_v3 = vadd.f32 %v202_v1, %v895_v5  ;;  %v226_v4 = vrot.slane %v224_v2, 6 }
 0x4c2   :  { %v760_v6 = vmul.f32 -1.442695, %v204_v3  ;;  %227 = vrot.lane.b32.xlu2 %v226_v4, %s878_s0 }
 0x4c4   :  { %805 = vpow2.f32 %v760_v6 }
 0x4ca   :  { %v806_v7 = vpop.eup %805 }
 0x4cb   :  { %v208_v8 = vadd.f32 1.0, %v806_v7 }
 0x4cd   :  { %807 = vrcp.f32 %v208_v8  ;;  %v220_v12 = vand.u32 2147483648, %v208_v8  ;;  %v218_v14 = vand.u32 2147483647, %v208_v8  ;;  %vm214_vm11 = vweird.f32 %v208_v8 }
 0x4cf   :  { %v221_v16 = vor.u32 1.1754944e-38, %v220_v12  ;;  %vm219_vm13 = vcmp.eq.f32.partialorder %v218_v14, 8.507059e+37 }
 0x4d3   :  { %v808_v9 = vpop.eup %807 }
 0x4d4   :  { %v210_v10 = vmul.f32 %v808_v9, %v208_v8  ;;  %vm215_vm10 = vweird.f32 %v808_v9 }
 0x4d5   :  { %vm216_vm12 = vmor %vm214_vm11, %vm215_vm10  ;;  %vm613_vm10 = vcmask 1043456  }
 0x4d6   :  { %v211_v11 = vsub.f32 1.0, %v210_v10 }
 0x4d8   :  { %v212_v13 = vmul.f32 %v808_v9, %v211_v11 }
 0x4da   :  { %v213_v15 = vadd.f32 %v808_v9, %v212_v13 }
 0x4dc   :  { %v217_v17 = vsel %vm216_vm12, %v808_v9, %v213_v15 }
 0x4dd   :  { %v222_v19 = vsel %vm219_vm13, %v221_v16, %v217_v17 }
 0x4de   :  { %v245_v20 = vmul.f32 %v243_v18, %v222_v19  ;;  %v237_v26 = vsub.f32 1.0, %v222_v19 }
 0x51c   :  { %v228_v21 = vpop.permute.xlu2 %227 }
 0x51d   :  { %v230_v22 = vmul.f32 %v228_v21, %v222_v19 }
 0x51f   :  { %232 = vrot.lane.b32.xlu0 %v230_v22, %s878_s0 }
 0x591   :  { %v233_v23 = vpop.permute.xlu0 %232 }
 0x592   :  { %v235_v24 = vadd.f32 %v233_v23, %v895_v5 }
 0x594   :  { %809 = vtanh.f32 %v235_v24 }
 0x59a   :  { %v810_v25 = vpop.eup %809 }
 0x59b   :  { %239 = vrot.lane.b32.xlu1 %v810_v25, %s879_s13 }
 0x60d   :  { %v240_v27 = vpop.permute.xlu1 %239 }
 0x60e   :  { %v242_v28 = vmul.f32 %v240_v27, %v237_v26 }
 0x610   :  { %v246_v29 = vadd.f32 %v245_v20, %v242_v28 }
 0x612   :  { %v610_v33 = vsel %vm609_vm15, %v608_v31, %v246_v29  ;;  %v248_v34 = vrot.slane %v246_v29, 2  ;;  %v315_v59 = vrot.slane %v246_v29, 7  ;;  %vm615_vm15 = vcmask 1044480  }
 0x614   :  { %249 = vrot.lane.b32.xlu2 %v248_v34, %s879_s13 }
 0x66e   :  { %v250_v35 = vpop.permute.xlu2 %249 }
 0x66f   :  { %761 = vmatmul.msk.f32.vlgmr.msra.gmra.mxu3 %vm102_vm5, %v250_v35 }
 0x6f2   :  { %v270_v36 = vpop.f32.mrf.mxu3 }
 0x6f3   :  { %v296_v37 = vadd.f32 %v270_v36, %v907_v32  ;;  %v274_v39 = vrot.slane %v270_v36, 5 }
 0x6f5   :  { %v298_v38 = vrot.slane %v296_v37, 5  ;;  %v276_v40 = vadd.f32 %v274_v39, %v895_v5 }
 0x6f7   :  { %299 = vrot.lane.b32.xlu0 %v298_v38, %s878_s0  ;;  %v762_v41 = vmul.f32 -1.442695, %v276_v40 }
 0x6f9   :  { %811 = vpow2.f32 %v762_v41 }
 0x6ff   :  { %v812_v42 = vpop.eup %811 }
 0x700   :  { %v280_v30 = vadd.f32 1.0, %v812_v42 }
 0x702   :  { %813 = vrcp.f32 %v280_v30  ;;  %v292_v48 = vand.u32 2147483648, %v280_v30  ;;  %vm286_vm1 = vweird.f32 %v280_v30  ;;  %v290_v49 = vand.u32 2147483647, %v280_v30 }
 0x704   :  { %v293_v51 = vor.u32 1.1754944e-38, %v292_v48  ;;  %vm291_vm3 = vcmp.eq.f32.partialorder %v290_v49, 8.507059e+37 }
 0x708   :  { %v814_v43 = vpop.eup %813 }
 0x709   :  { %v282_v44 = vmul.f32 %v814_v43, %v280_v30  ;;  %vm287_vm0 = vweird.f32 %v814_v43 }
 0x70a   :  { %vm288_vm2 = vmor %vm286_vm1, %vm287_vm0 }
 0x70b   :  { %v283_v45 = vsub.f32 1.0, %v282_v44 }
 0x70d   :  { %v284_v46 = vmul.f32 %v814_v43, %v283_v45 }
 0x70f   :  { %v285_v47 = vadd.f32 %v814_v43, %v284_v46 }
 0x711   :  { %v289_v50 = vsel %vm288_vm2, %v814_v43, %v285_v47 }
 0x712   :  { %v294_v53 = vsel %vm291_vm3, %v293_v51, %v289_v50 }
 0x713   :  { %v309_v58 = vsub.f32 1.0, %v294_v53  ;;  %v317_v61 = vmul.f32 %v315_v59, %v294_v53 }
 0x769   :  { %v300_v52 = vpop.permute.xlu0 %299 }
 0x76a   :  { %v302_v54 = vmul.f32 %v300_v52, %v294_v53 }
 0x76c   :  { %304 = vrot.lane.b32.xlu1 %v302_v54, %s878_s0 }
 0x7de   :  { %v305_v55 = vpop.permute.xlu1 %304 }
 0x7df   :  { %v307_v56 = vadd.f32 %v305_v55, %v895_v5 }
 0x7e1   :  { %815 = vtanh.f32 %v307_v56 }
 0x7e7   :  { %v816_v57 = vpop.eup %815 }
 0x7e8   :  { %311 = vrot.lane.b32.xlu2 %v816_v57, %s879_s13 }
 0x842   :  { %v312_v60 = vpop.permute.xlu2 %311 }
 0x843   :  { %v314_v62 = vmul.f32 %v312_v60, %v309_v58 }
 0x845   :  { %v318_v63 = vadd.f32 %v317_v61, %v314_v62 }
 0x847   :  { %v612_v0 = vsel %vm611_vm4, %v610_v33, %v318_v63  ;;  %v320_v1 = vrot.slane %v318_v63, 3  ;;  %v387_v28 = vrot.slane %v318_v63, 7  ;;  %vm617_vm4 = vcmask 1045504  }
 0x849   :  { %321 = vrot.lane.b32.xlu0 %v320_v1, %s879_s13 }
 0x8bb   :  { %v322_v2 = vpop.permute.xlu0 %321 }
 0x8bc   :  { %763 = vmatmul.msk.f32.vlgmr.msrb.gmra.mxu0 %vm102_vm5, %v322_v2 }
 0x939   :  { %v342_v3 = vpop.f32.mrf.mxu0 }
 0x93a   :  { %v368_v4 = vadd.f32 %v342_v3, %v907_v32  ;;  %v346_v7 = vrot.slane %v342_v3, 4 }
 0x93c   :  { %v370_v6 = vrot.slane %v368_v4, 4  ;;  %v348_v8 = vadd.f32 %v346_v7, %v895_v5 }
 0x93e   :  { %371 = vrot.lane.b32.xlu1 %v370_v6, %s878_s0  ;;  %v764_v9 = vmul.f32 -1.442695, %v348_v8 }
 0x940   :  { %817 = vpow2.f32 %v764_v9 }
 0x946   :  { %v818_v10 = vpop.eup %817 }
 0x947   :  { %v352_v11 = vadd.f32 1.0, %v818_v10 }
 0x949   :  { %819 = vrcp.f32 %v352_v11  ;;  %v364_v17 = vand.u32 2147483648, %v352_v11  ;;  %vm358_vm7 = vweird.f32 %v352_v11  ;;  %v362_v18 = vand.u32 2147483647, %v352_v11 }
 0x94b   :  { %v365_v20 = vor.u32 1.1754944e-38, %v364_v17  ;;  %vm363_vm9 = vcmp.eq.f32.partialorder %v362_v18, 8.507059e+37 }
 0x94f   :  { %v820_v12 = vpop.eup %819 }
 0x950   :  { %v354_v13 = vmul.f32 %v820_v12, %v352_v11  ;;  %vm359_vm6 = vweird.f32 %v820_v12 }
 0x951   :  { %vm360_vm8 = vmor %vm358_vm7, %vm359_vm6 }
 0x952   :  { %v355_v14 = vsub.f32 1.0, %v354_v13 }
 0x954   :  { %v356_v15 = vmul.f32 %v820_v12, %v355_v14 }
 0x956   :  { %v357_v16 = vadd.f32 %v820_v12, %v356_v15 }
 0x958   :  { %v361_v19 = vsel %vm360_vm8, %v820_v12, %v357_v16 }
 0x959   :  { %v366_v22 = vsel %vm363_vm9, %v365_v20, %v361_v19 }
 0x95a   :  { %v381_v27 = vsub.f32 1.0, %v366_v22  ;;  %v389_v31 = vmul.f32 %v387_v28, %v366_v22 }
 0x9b0   :  { %v372_v21 = vpop.permute.xlu1 %371 }
 0x9b1   :  { %v374_v23 = vmul.f32 %v372_v21, %v366_v22 }
 0x9b3   :  { %376 = vrot.lane.b32.xlu2 %v374_v23, %s878_s0 }
 0xa0d   :  { %v377_v24 = vpop.permute.xlu2 %376 }
 0xa0e   :  { %v379_v25 = vadd.f32 %v377_v24, %v895_v5 }
 0xa10   :  { %821 = vtanh.f32 %v379_v25 }
 0xa16   :  { %v822_v26 = vpop.eup %821 }
 0xa17   :  { %383 = vrot.lane.b32.xlu0 %v822_v26, %s879_s13 }
 0xa89   :  { %v384_v29 = vpop.permute.xlu0 %383 }
 0xa8a   :  { %v386_v33 = vmul.f32 %v384_v29, %v381_v27 }
 0xa8c   :  { %v390_v34 = vadd.f32 %v389_v31, %v386_v33 }
 0xa8e   :  { %v614_v35 = vsel %vm613_vm10, %v612_v0, %v390_v34  ;;  %v392_v36 = vrot.slane %v390_v34, 4  ;;  %v459_v54 = vrot.slane %v390_v34, 7  ;;  %vm619_vm10 = vcmask 1046528  }
 0xa90   :  { %393 = vrot.lane.b32.xlu1 %v392_v36, %s879_s13 }
 0xb02   :  { %v394_v37 = vpop.permute.xlu1 %393 }
 0xb03   :  { %765 = vmatmul.msk.f32.vlgmr.msrb.gmra.mxu1 %vm102_vm5, %v394_v37 }
 0xb80   :  { %v414_v38 = vpop.f32.mrf.mxu1 }
 0xb81   :  { %v418_v39 = vrot.slane %v414_v38, 3  ;;  %v440_v40 = vadd.f32 %v414_v38, %v907_v32 }
 0xb83   :  { %v420_v41 = vadd.f32 %v418_v39, %v895_v5  ;;  %v442_v42 = vrot.slane %v440_v40, 3 }
 0xb85   :  { %v766_v30 = vmul.f32 -1.442695, %v420_v41  ;;  %443 = vrot.lane.b32.xlu2 %v442_v42, %s878_s0 }
 0xb87   :  { %823 = vpow2.f32 %v766_v30 }
 0xb8d   :  { %v824_v43 = vpop.eup %823 }
 0xb8e   :  { %v424_v44 = vadd.f32 1.0, %v824_v43 }
 0xb90   :  { %825 = vrcp.f32 %v424_v44  ;;  %v436_v48 = vand.u32 2147483648, %v424_v44  ;;  %v434_v50 = vand.u32 2147483647, %v424_v44  ;;  %vm430_vm12 = vweird.f32 %v424_v44 }
 0xb92   :  { %v437_v52 = vor.u32 1.1754944e-38, %v436_v48  ;;  %vm435_vm14 = vcmp.eq.f32.partialorder %v434_v50, 8.507059e+37 }
 0xb96   :  { %v826_v45 = vpop.eup %825 }
 0xb97   :  { %v426_v46 = vmul.f32 %v826_v45, %v424_v44  ;;  %vm431_vm11 = vweird.f32 %v826_v45 }
 0xb98   :  { %vm432_vm13 = vmor %vm430_vm12, %vm431_vm11 }
 0xb99   :  { %v427_v47 = vsub.f32 1.0, %v426_v46 }
 0xb9b   :  { %v428_v49 = vmul.f32 %v826_v45, %v427_v47 }
 0xb9d   :  { %v429_v51 = vadd.f32 %v826_v45, %v428_v49 }
 0xb9f   :  { %v433_v53 = vsel %vm432_vm13, %v826_v45, %v429_v51 }
 0xba0   :  { %v438_v55 = vsel %vm435_vm14, %v437_v52, %v433_v53 }
 0xba1   :  { %v461_v56 = vmul.f32 %v459_v54, %v438_v55  ;;  %v453_v62 = vsub.f32 1.0, %v438_v55 }
 0xbdf   :  { %v444_v57 = vpop.permute.xlu2 %443 }
 0xbe0   :  { %v446_v58 = vmul.f32 %v444_v57, %v438_v55 }
 0xbe2   :  { %448 = vrot.lane.b32.xlu0 %v446_v58, %s878_s0 }
 0xc54   :  { %v449_v59 = vpop.permute.xlu0 %448 }
 0xc55   :  { %v451_v60 = vadd.f32 %v449_v59, %v895_v5 }
 0xc57   :  { %827 = vtanh.f32 %v451_v60 }
 0xc5d   :  { %v828_v61 = vpop.eup %827 }
 0xc5e   :  { %455 = vrot.lane.b32.xlu1 %v828_v61, %s879_s13  ;;  %v34_v61 = vld [vmem:[#allocation2 + $0x50] sm:$0xff] }
 0xc5f   :  { %639 = vmatpush.msra.mxu0 %v34_v61 }
 0xcd0   :  { %v456_v63 = vpop.permute.xlu1 %455 }
 0xcd1   :  { %v458_v0 = vmul.f32 %v456_v63, %v453_v62  ;;  %v33_v62 = vld [vmem:[#allocation2 + $0x48] sm:$0xff]  ;;  %v32_v63 = vld [vmem:[#allocation2 + $0x40] sm:$0xff] }
 0xcd2   :  { %640 = vmatpush.msra.mxu0 %v33_v62 }
 0xcd3   :  { %v462_v1 = vadd.f32 %v461_v56, %v458_v0  ;;  %v31_v0 = vld [vmem:[#allocation2 + $0x38] sm:$0xff] }
 0xcd4   :  { %641 = vmatpush.msra.mxu0 %v32_v63 }
 0xcd5   :  { %v464_v2 = vrot.slane %v462_v1, 5  ;;  %v616_v3 = vsel %vm615_vm15, %v614_v35, %v462_v1  ;;  %v531_v31 = vrot.slane %v462_v1, 7 }
 0xcd6   :  { %642 = vmatpush.msra.mxu0 %v31_v0 }
 0xcd7   :  { %465 = vrot.lane.b32.xlu2 %v464_v2, %s879_s13 }
 0xd31   :  { %v466_v4 = vpop.permute.xlu2 %465 }
 0xd32   :  { %767 = vmatmul.msk.f32.vlgmr.msrb.gmra.mxu2 %vm102_vm5, %v466_v4 }
 0xdb5   :  { %v486_v6 = vpop.f32.mrf.mxu2 }
 0xdb6   :  { %v512_v7 = vadd.f32 %v486_v6, %v907_v32  ;;  %v490_v9 = vrot.slane %v486_v6, 2 }
 0xdb8   :  { %v514_v8 = vrot.slane %v512_v7, 2  ;;  %v492_v10 = vadd.f32 %v490_v9, %v895_v5  ;;  %v880_v9 = vmov 8.0  }
 0xdba   :  { %515 = vrot.lane.b32.xlu0 %v514_v8, %s878_s0  ;;  %v768_v11 = vmul.f32 -1.442695, %v492_v10 }
 0xdbc   :  { %829 = vpow2.f32 %v768_v11  ;;  %v788_v11 = vld [vmem:[#allocation2 + $0x5a] ss:$0 sm:$0xff] }
 0xdc2   :  { %v830_v12 = vpop.eup %829 }
 0xdc3   :  { %v496_v13 = vadd.f32 1.0, %v830_v12 }
 0xdc5   :  { %831 = vrcp.f32 %v496_v13  ;;  %v508_v19 = vand.u32 2147483648, %v496_v13  ;;  %vm502_vm1 = vweird.f32 %v496_v13  ;;  %v506_v20 = vand.u32 2147483647, %v496_v13 }
 0xdc7   :  { %v509_v22 = vor.u32 1.1754944e-38, %v508_v19  ;;  %vm507_vm3 = vcmp.eq.f32.partialorder %v506_v20, 8.507059e+37 }
 0xdcb   :  { %v832_v14 = vpop.eup %831 }
 0xdcc   :  { %v498_v15 = vmul.f32 %v832_v14, %v496_v13  ;;  %vm503_vm0 = vweird.f32 %v832_v14 }
 0xdcd   :  { %vm504_vm2 = vmor %vm502_vm1, %vm503_vm0 }
 0xdce   :  { %v499_v16 = vsub.f32 1.0, %v498_v15 }
 0xdd0   :  { %v500_v17 = vmul.f32 %v832_v14, %v499_v16 }
 0xdd2   :  { %v501_v18 = vadd.f32 %v832_v14, %v500_v17 }
 0xdd4   :  { %v505_v21 = vsel %vm504_vm2, %v832_v14, %v501_v18  ;;  %vm717_vm2 = vcmask 7168  }
 0xdd5   :  { %v510_v24 = vsel %vm507_vm3, %v509_v22, %v505_v21 }
 0xdd6   :  { %v525_v29 = vsub.f32 1.0, %v510_v24  ;;  %v533_v34 = vmul.f32 %v531_v31, %v510_v24 }
 0xe2c   :  { %v516_v23 = vpop.permute.xlu0 %515 }
 0xe2d   :  { %v518_v25 = vmul.f32 %v516_v23, %v510_v24 }
 0xe2f   :  { %520 = vrot.lane.b32.xlu1 %v518_v25, %s878_s0 }
 0xea1   :  { %v521_v26 = vpop.permute.xlu1 %520 }
 0xea2   :  { %v523_v27 = vadd.f32 %v521_v26, %v895_v5 }
 0xea4   :  { %833 = vtanh.f32 %v523_v27 }
 0xeaa   :  { %v834_v28 = vpop.eup %833 }
 0xeab   :  { %527 = vrot.lane.b32.xlu2 %v834_v28, %s879_s13 }
 0xf05   :  { %v528_v33 = vpop.permute.xlu2 %527 }
 0xf06   :  { %v530_v35 = vmul.f32 %v528_v33, %v525_v29 }
 0xf08   :  { %v534_v36 = vadd.f32 %v533_v34, %v530_v35 }
 0xf0a   :  { %v536_v37 = vrot.slane %v534_v36, 6  ;;  %v618_v38 = vsel %vm617_vm4, %v616_v3, %v534_v36  ;;  %v603_v2 = vrot.slane %v534_v36, 7 }
 0xf0c   :  { %537 = vrot.lane.b32.xlu0 %v536_v37, %s879_s13 }
 0xf7e   :  { %v538_v39 = vpop.permute.xlu0 %537 }
 0xf7f   :  { %769 = vmatmul.msk.f32.vlgmr.msrb.gmra.mxu3 %vm102_vm5, %v538_v39 }
0x1002   :  { %v558_v40 = vpop.f32.mrf.mxu3 }
0x1003   :  { %v584_v41 = vadd.f32 %v558_v40, %v907_v32  ;;  %v562_v30 = vrot.slane %v558_v40, 1 }
0x1005   :  { %v586_v42 = vrot.slane %v584_v41, 1  ;;  %v564_v43 = vadd.f32 %v562_v30, %v895_v5 }
0x1007   :  { %587 = vrot.lane.b32.xlu1 %v586_v42, %s878_s0  ;;  %v770_v44 = vmul.f32 -1.442695, %v564_v43 }
0x1009   :  { %835 = vpow2.f32 %v770_v44 }
0x100f   :  { %v836_v45 = vpop.eup %835 }
0x1010   :  { %v568_v46 = vadd.f32 1.0, %v836_v45  ;;  %v789_v45 = vld [vmem:[#allocation2 + $0x5b] ss:$0 sm:$0xff] }
0x1012   :  { %837 = vrcp.f32 %v568_v46  ;;  %v580_v52 = vand.u32 2147483648, %v568_v46  ;;  %vm574_vm7 = vweird.f32 %v568_v46  ;;  %v578_v32 = vand.u32 2147483647, %v568_v46 }
0x1014   :  { %v581_v54 = vor.u32 1.1754944e-38, %v580_v52  ;;  %vm579_vm9 = vcmp.eq.f32.partialorder %v578_v32, 8.507059e+37 }
0x1018   :  { %v838_v47 = vpop.eup %837 }
0x1019   :  { %v570_v48 = vmul.f32 %v838_v47, %v568_v46  ;;  %vm575_vm6 = vweird.f32 %v838_v47 }
0x101a   :  { %vm576_vm8 = vmor %vm574_vm7, %vm575_vm6 }
0x101b   :  { %v571_v49 = vsub.f32 1.0, %v570_v48  ;;  %v790_v48 = vld [vmem:[#allocation2 + $0x5c] ss:$0 sm:$0xff] }
0x101d   :  { %v572_v50 = vmul.f32 %v838_v47, %v571_v49 }
0x101f   :  { %v573_v51 = vadd.f32 %v838_v47, %v572_v50 }
0x1021   :  { %v577_v53 = vsel %vm576_vm8, %v838_v47, %v573_v51  ;;  %v791_v51 = vld [vmem:[#allocation2 + $0x5d] ss:$0 sm:$0xff] }
0x1022   :  { %v582_v56 = vsel %vm579_vm9, %v581_v54, %v577_v53  ;;  %v881_v54 = vmov 0  }
0x1023   :  { %v597_v1 = vsub.f32 1.0, %v582_v56  ;;  %v605_v4 = vmul.f32 %v603_v2, %v582_v56  ;;  %785 = vset.pattern.permute.xlu1 %v881_v54  ;;  %786 = vset.pattern.permute.xlu0 %v881_v54 }
0x1079   :  { %v588_v55 = vpop.permute.xlu1 %587 }
0x107a   :  { %v590_v57 = vmul.f32 %v588_v55, %v582_v56  ;;  %v792_v55 = vld [vmem:[#allocation2 + $0x5e] ss:$0 sm:$0xff] }
0x107c   :  { %592 = vrot.lane.b32.xlu2 %v590_v57, %s878_s0 }
0x10d6   :  { %v593_v58 = vpop.permute.xlu2 %592 }
0x10d7   :  { %v595_v59 = vadd.f32 %v593_v58, %v895_v5 }
0x10d9   :  { %839 = vtanh.f32 %v595_v59 }
0x10da   :  { %841 = vrcp.f32 %v880_v9 }
0x10df   :  { %v840_v60 = vpop.eup %839 }
0x10e0   :  { %599 = vrot.lane.b32.xlu0 %v840_v60, %s879_s13  ;;  %v842_v10 = vpop.eup %841 }
0x10e1   :  { %v655_v12 = vmul.f32 8.0, %v842_v10  ;;  %vm659_vm11 = vweird.f32 %v842_v10 }
0x10e3   :  { %v656_v15 = vsub.f32 1.0, %v655_v12 }
0x10e5   :  { %v657_v18 = vmul.f32 %v842_v10, %v656_v15 }
0x10e7   :  { %v658_v21 = vadd.f32 %v842_v10, %v657_v18 }
0x10e9   :  { %v968_v24 = vsel %vm659_vm11, %v842_v10, %v658_v21 }
0x1152   :  { %v600_v3 = vpop.permute.xlu0 %599 }
0x1153   :  { %v602_v6 = vmul.f32 %v600_v3, %v597_v1 }
0x1155   :  { %v606_v7 = vadd.f32 %v605_v4, %v602_v6 }
0x1157   :  { %v620_v5 = vsel %vm619_vm10, %v618_v38, %v606_v7 }
0x1158   :  { %623 = vrot.lane.b32.xlu1 %v620_v5, %s879_s13 }
0x11ca   :  { %v624_v8 = vpop.permute.xlu1 %623 }
0x11cb   :  { %771 = vmatmul.msk.f32.vlgmr.msra.gmra.mxu0 %vm102_vm5, %v624_v8 }
0x1248   :  { %v644_v13 = vpop.f32.mrf.mxu0 }
0x1249   :  { %v645_v14 = vadd.f32 %v788_v11, %v644_v13 }
0x124b   :  { %v647_v16 = vsel %vm102_vm5, %v645_v14, 0.0 }
0x124c   :  { %v648_v17 = vrot.slane %v647_v16, 4 }
0x124e   :  { %v649_v19 = vadd.f32 %v648_v17, %v647_v16  ;;  %v737_v17 = vlaneseq }
0x1250   :  { %v650_v20 = vrot.slane %v649_v19, 2  ;;  %v738_v18 = vand.u32 127, %v737_v17 }
0x1252   :  { %v651_v22 = vadd.f32 %v650_v20, %v649_v19  ;;  %vm740_vm3 = vcmp.eq.s32.totalorder %v738_v18, 1  ;;  %vm739_vm4 = vcmp.eq.s32.totalorder %v738_v18, 0 }
0x1254   :  { %v652_v23 = vrot.slane %v651_v22, 1 }
0x1256   :  { %v653_v25 = vadd.f32 %v652_v23, %v651_v22 }
0x1258   :  { %v661_v26 = vmul.f32 %v968_v24, %v653_v25 }
0x125a   :  { %v662_v27 = vsub.f32 %v645_v14, %v661_v26 }
0x125c   :  { %v663_v28 = vmul.f32 %v662_v27, %v662_v27 }
0x125e   :  { %v664_v29 = vsel %vm102_vm5, %v663_v28, 0.0 }
0x125f   :  { %v665_v31 = vrot.slane %v664_v29, 4 }
0x1261   :  { %v666_v33 = vadd.f32 %v665_v31, %v664_v29 }
0x1263   :  { %v667_v34 = vrot.slane %v666_v33, 2 }
0x1265   :  { %v668_v35 = vadd.f32 %v667_v34, %v666_v33 }
0x1267   :  { %v669_v36 = vrot.slane %v668_v35, 1 }
0x1269   :  { %v670_v37 = vadd.f32 %v669_v36, %v668_v35 }
0x126b   :  { %v671_v38 = vmul.f32 %v670_v37, %v968_v24 }
0x126d   :  { %v672_v39 = vadd.f32 1e-05, %v671_v38 }
0x126f   :  { %843 = vrsqrt.f32 %v672_v39  ;;  %vm679_vm13 = vweird.f32 %v672_v39 }
0x1275   :  { %v844_v40 = vpop.eup %843 }
0x1276   :  { %v674_v41 = vmul.f32 %v844_v40, %v672_v39  ;;  %vm680_vm12 = vweird.f32 %v844_v40 }
0x1277   :  { %vm681_vm14 = vmor %vm679_vm13, %vm680_vm12 }
0x1278   :  { %v675_v42 = vmul.f32 %v844_v40, %v674_v41 }
0x127a   :  { %v676_v30 = vmul.f32 0.5, %v675_v42 }
0x127c   :  { %v677_v43 = vsub.f32 1.5, %v676_v30 }
0x127e   :  { %v678_v44 = vmul.f32 %v844_v40, %v677_v43 }
0x1280   :  { %v682_v46 = vsel %vm681_vm14, %v844_v40, %v678_v44 }
0x1281   :  { %v683_v47 = vmul.f32 %v682_v46, %v662_v27 }
0x1283   :  { %v685_v49 = vmul.f32 %v789_v45, %v683_v47 }
0x1285   :  { %v687_v50 = vadd.f32 %v790_v48, %v685_v49 }
0x1287   :  { %v688_v52 = vmax.f32 %v687_v50, 0.0 }
0x1289   :  { %v690_v32 = vmul.f32 %v791_v51, %v688_v52 }
0x128b   :  { %v691_v53 = vsel %vm102_vm5, %v690_v32, 0.0 }
0x128c   :  { %692 = vadd.xlane.f32.xlu2 %v691_v53 }
0x12ff   :  { %v693_v56 = vpop.xlane.xlu2 %692 }
0x1300   :  { %v695_v57 = vadd.f32 %v792_v55, %v693_v56 }
0x1302   :  { %v772_v58 = vmul.f32 -1.442695, %v695_v57 }
0x1304   :  { %845 = vpow2.f32 %v772_v58 }
0x130a   :  { %v846_v59 = vpop.eup %845 }
0x130b   :  { %v699_v60 = vadd.f32 1.0, %v846_v59 }
0x130d   :  { %847 = vrcp.f32 %v699_v60  ;;  %v711_v0 = vand.u32 2147483648, %v699_v60  ;;  %v709_v2 = vand.u32 2147483647, %v699_v60  ;;  %vm705_vm5 = vweird.f32 %v699_v60 }
0x130f   :  { %v712_v4 = vor.u32 1.1754944e-38, %v711_v0  ;;  %vm710_vm1 = vcmp.eq.f32.partialorder %v709_v2, 8.507059e+37 }
0x1313   :  { %v848_v61 = vpop.eup %847 }
0x1314   :  { %v701_v62 = vmul.f32 %v848_v61, %v699_v60  ;;  %vm706_vm15 = vweird.f32 %v848_v61 }
0x1315   :  { %vm707_vm0 = vmor %vm705_vm5, %vm706_vm15 }
0x1316   :  { %v702_v63 = vsub.f32 1.0, %v701_v62 }
0x1318   :  { %v703_v1 = vmul.f32 %v848_v61, %v702_v63 }
0x131a   :  { %v704_v3 = vadd.f32 %v848_v61, %v703_v1 }
0x131c   :  { %v708_v6 = vsel %vm707_vm0, %v848_v61, %v704_v3 }
0x131d   :  { %v713_v7 = vsel %vm710_vm1, %v712_v4, %v708_v6 }
0x131e   :  { %745 = vperm.xlu1 %785, %v713_v7   ;;  %v773_v5 = vadd.f32 -0.5, %v713_v7 }
0x1320   :  { %v716_v8 = vmul.f32 %v773_v5, %v773_v5 }
0x1322   :  { %v718_v9 = vsel %vm717_vm2, %v716_v8, 0.0 }
0x1323   :  { %719 = vadd.xlane.f32.xlu0 %v718_v9 }
0x1390   :  { %v746_v20 = vpop.permute.xlu1 %745 }
0x1396   :  { %v720_v10 = vpop.xlane.xlu0 %719 }
0x1397   :  { %v721_v11 = vrot.slane %v720_v10, 4 }
0x1399   :  { %v722_v12 = vadd.f32 %v721_v11, %v720_v10 }
0x139b   :  { %v723_v13 = vrot.slane %v722_v12, 2 }
0x139d   :  { %v724_v14 = vadd.f32 %v723_v13, %v722_v12 }
0x139f   :  { %v725_v15 = vrot.slane %v724_v14, 1 }
0x13a1   :  { %v726_v16 = vadd.f32 %v725_v15, %v724_v14 }
0x13a3   :  { %774 = vpush %v726_v16 }
0x13a4   :  { %776 = vpush %v968_v24 }
0x13d4   :  { %s775_s14 = spop %774 }
0x13d5   :  { %s777_s15 = spop %776 }
0x13d6   :  { %s736_s16 = smul.f32 %s777_s15, %s775_s14 }
0x13d8   :  { %v741_v19 = vstv %s736_s16 }
0x13d9   :  { %v742_v21 = vsel %vm740_vm3, %v741_v19, 0.0 }
0x13da   :  { %v748_v22 = vsel %vm739_vm4, %v746_v20, %v742_v21 }
0x13db   :  { %749 = vst [vmem:[%s979_s1] sm:$0xff] %v748_v22 }
0x13dc   :  { %754 = vsyncpa [#allocation3], 1 }

</bundles_post_ra>
